<compile_context>
chip_gen: v7x
topology: tpu7x:2x2x1
jax: 0.10.0
libtpu: 0.0.40
codegen_flags: <defaults>
</compile_context>

<pallas_src>
import functools
import math

import jax
import jax.numpy as jnp
from jax.experimental import pallas as pl
from jax.experimental.pallas import tpu as pltpu

_INV_SQRT2 = 1.0 / math.sqrt(2.0)


def _round_up(x, m):
    return ((x + m - 1) // m) * m


def _gelu(h, approximate):
    if approximate:
        # tanh approximation rides the EUP slot; not bit-identical to
        # torch.nn.GELU()'s default exact-erf form.
        return jax.nn.gelu(h, approximate=True)
    return 0.5 * h * (1.0 + jax.lax.erf(h * _INV_SQRT2))


def _mlp_kernel_resident(x_ref, w1_ref, b1_ref, w2_ref, b2_ref, o_ref, *,
                         approximate_gelu):
    """fc1 -> GELU -> fc2 for one (tm, C) token tile; full weights resident.

    Dropout with p=0.0 is the identity (eval semantics).
    """
    x = x_ref[...].astype(w1_ref.dtype)            # VPU cast, hidden under the MXU
    h = jnp.dot(x, w1_ref[...], preferred_element_type=jnp.float32)
    h = _gelu(h + b1_ref[...], approximate_gelu)   # f32 bias + GELU
    out = jnp.dot(h.astype(w2_ref.dtype), w2_ref[...],
                  preferred_element_type=jnp.float32)
    o_ref[...] = (out + b2_ref[...]).astype(o_ref.dtype)


def _mlp_kernel_tiled(x_ref, w1_ref, b1_ref, w2_ref, b2_ref, o_ref, acc_ref, *,
                      approximate_gelu):
    """Hidden dim tiled over grid axis 1; fc2 partials accumulate in f32 scratch."""
    j = pl.program_id(1)
    x = x_ref[...].astype(w1_ref.dtype)
    h = jnp.dot(x, w1_ref[...], preferred_element_type=jnp.float32)
    h = _gelu(h + b1_ref[...], approximate_gelu)
    part = jnp.dot(h.astype(w2_ref.dtype), w2_ref[...],
                   preferred_element_type=jnp.float32)

    @pl.when(j == 0)
    def _():
        acc_ref[...] = part                         # no zero-init + RMW

    @pl.when(j > 0)
    def _():
        acc_ref[...] += part

    @pl.when(j == pl.num_programs(1) - 1)
    def _():
        o_ref[...] = (acc_ref[...] + b2_ref[...]).astype(o_ref.dtype)


def _vmem_capacity_bytes():
    try:
        info = pltpu.get_tpu_info()
        for name in ("vmem_capacity_bytes", "vmem_size_bytes", "vmem_bytes"):
            cap = getattr(info, name, None)
            if cap:
                return int(cap)
    except Exception:
        pass
    return 64 * 2 ** 20      # conservative: v7x per-TC VMEM


def _estimate_vmem_bytes(tm, th, C, c_out_pad, x_it, mm_it, out_it, tiled):
    weights = (C * th + th * c_out_pad) * mm_it + (th + c_out_pad) * 4
    est = 2 * weights                      # BlockSpec double-buffers every input
    est += 2 * tm * C * x_it               # x tiles
    est += 2 * tm * c_out_pad * out_it     # output tiles
    est += tm * th * 4                     # f32 hidden activations
    est += tm * c_out_pad * 4              # f32 fc2 result before cast
    if tiled:
        est += tm * c_out_pad * 4          # f32 accumulator scratch
    return est


def mlp_pallas(x, w1, b1, w2, b2, *, tm=512, th_max=512,
               matmul_dtype=jnp.bfloat16, approximate_gelu=False,
               force_th=None, vmem_limit_bytes=None):
    """Mlp forward: dropout(fc2(gelu(fc1(x)))) with p=0 (identity).

    x : (B, N, C); w1: (C, H); b1: (H,); w2: (H, C_out); b2: (C_out,)
    matmul_dtype: dtype fed to the MXU (None -> keep the weight dtype).
                  Accumulation is f32; bias adds and GELU run in f32.
    Weights already in matmul_dtype (e.g. pre-cast bf16) are used as-is.
    """
    # TODO(synk): nn.Dropout with p>0 (train mode) is not implemented; p=0.0 is identity.
    B, N, C = x.shape
    H = w1.shape[1]
    C_out = w2.shape[1]
    assert w1.shape == (C, H) and w2.shape == (H, C_out)
    M = B * N
    out_dtype = x.dtype

    mm_dtype = (jnp.dtype(matmul_dtype) if matmul_dtype is not None
                else jnp.dtype(w1.dtype))
    x_it = jnp.dtype(x.dtype).itemsize
    mm_it = mm_dtype.itemsize
    out_it = jnp.dtype(out_dtype).itemsize

    c_out_pad = _round_up(C_out, 128)       # lane-dense output stores
    h_128 = _round_up(H, 128)

    cap = _vmem_capacity_bytes()
    safe = int(cap * 0.85)

    # --- token-tile (M) size -------------------------------------------------
    tm = max(128, _round_up(int(tm), 128))
    tm = min(tm, _round_up(M, 128))

    # --- hidden tiling: keep w1/w2 resident whenever they fit ----------------
    if force_th is not None:
        tiled = True
        th = min(_round_up(int(force_th), 128), h_128)
    elif _estimate_vmem_bytes(tm, h_128, C, c_out_pad, x_it, mm_it, out_it,
                              tiled=False) <= safe:
        tiled = False
        th = h_128
    else:
        tiled = True
        # Streaming weights: bigger token tiles raise FLOPs per weight byte.
        tm = min(max(tm, 512), _round_up(M, 128))
        th = min(_round_up(min(th_max, H), 128), h_128)
        # Prefer shrinking th (extra accumulation passes) over tm (weight reuse).
        while th > 128 and _estimate_vmem_bytes(tm, th, C, c_out_pad, x_it,
                                                mm_it, out_it, True) > safe:
            th = max(128, _round_up(th // 2, 128))
        while tm > 128 and _estimate_vmem_bytes(tm, th, C, c_out_pad, x_it,
                                                mm_it, out_it, True) > safe:
            tm = max(128, _round_up(tm // 2, 128))

    # Megacore (v7x: 2 TCs): keep at least two M tiles when M allows.
    if M >= 256:
        tm = min(tm, max(128, _round_up(pl.cdiv(M, 2), 128)))

    M_pad = _round_up(M, tm)
    H_pad = _round_up(H, th)
    n_m = M_pad // tm
    n_h = H_pad // th

    # --- operand prep (no-ops for standard transformer widths) --------------
    x2 = x.reshape(M, C)                    # x stays in its own dtype; kernel casts
    if M_pad != M:
        x2 = jnp.pad(x2, ((0, M_pad - M), (0, 0)))

    w1p = w1 if w1.dtype == mm_dtype else w1.astype(mm_dtype)
    w2p = w2 if w2.dtype == mm_dtype else w2.astype(mm_dtype)
    b1p = b1.astype(jnp.float32)
    b2p = b2.astype(jnp.float32)
    if H_pad != H:
        # GELU(0 + 0) == 0 and zero w2 rows contribute 0, so padded hidden
        # columns are exact no-ops.
        w1p = jnp.pad(w1p, ((0, 0), (0, H_pad - H)))
        b1p = jnp.pad(b1p, ((0, H_pad - H),))
        w2p = jnp.pad(w2p, ((0, H_pad - H), (0, 0)))
    if c_out_pad != C_out:
        w2p = jnp.pad(w2p, ((0, 0), (0, c_out_pad - C_out)))
        b2p = jnp.pad(b2p, ((0, c_out_pad - C_out),))
    b1_2 = b1p.reshape(1, H_pad)
    b2_2 = b2p.reshape(1, c_out_pad)

    if vmem_limit_bytes is None:
        est = _estimate_vmem_bytes(tm, th, C, c_out_pad, x_it, mm_it, out_it, tiled)
        vmem_limit_bytes = int(min(max(int(1.5 * est), 32 * 2 ** 20), safe))

    if not tiled:
        grid = (n_m,)
        in_specs = [
            pl.BlockSpec((tm, C), lambda i: (i, 0)),              # x tile
            pl.BlockSpec((C, H_pad), lambda i: (0, 0)),           # w1 (resident)
            pl.BlockSpec((1, H_pad), lambda i: (0, 0)),           # b1
            pl.BlockSpec((H_pad, c_out_pad), lambda i: (0, 0)),   # w2 (resident)
            pl.BlockSpec((1, c_out_pad), lambda i: (0, 0)),       # b2
        ]
        out_specs = pl.BlockSpec((tm, c_out_pad), lambda i: (i, 0))
        scratch_shapes = []
        kernel = functools.partial(_mlp_kernel_resident,
                                   approximate_gelu=approximate_gelu)
        dim_sem = ("parallel",)
    else:
        grid = (n_m, n_h)
        in_specs = [
            pl.BlockSpec((tm, C), lambda i, j: (i, 0)),
            pl.BlockSpec((C, th), lambda i, j: (0, j)),
            pl.BlockSpec((1, th), lambda i, j: (0, j)),
            pl.BlockSpec((th, c_out_pad), lambda i, j: (j, 0)),
            pl.BlockSpec((1, c_out_pad), lambda i, j: (0, 0)),
        ]
        out_specs = pl.BlockSpec((tm, c_out_pad), lambda i, j: (i, 0))
        scratch_shapes = [pltpu.VMEM((tm, c_out_pad), jnp.float32)]
        kernel = functools.partial(_mlp_kernel_tiled,
                                   approximate_gelu=approximate_gelu)
        dim_sem = ("parallel", "arbitrary")   # H axis is the reduction, kept last

    out2 = pl.pallas_call(
        kernel,
        out_shape=jax.ShapeDtypeStruct((M_pad, c_out_pad), out_dtype),
        grid_spec=pltpu.PrefetchScalarGridSpec(
            num_scalar_prefetch=0,
            grid=grid,
            in_specs=in_specs,
            out_specs=out_specs,
            scratch_shapes=scratch_shapes,
        ),
        compiler_params=pltpu.CompilerParams(
            dimension_semantics=dim_sem,
            vmem_limit_bytes=int(vmem_limit_bytes),
        ),
    )(x2, w1p, b1_2, w2p, b2_2)

    return out2[:M, :C_out].reshape(B, N, C_out)


def init_mlp_params(key, in_features, hidden_features, out_features, dtype=jnp.float32):
    """PyTorch-nn.Linear-style uniform init (synthetic weights), stored transposed."""
    k1, k2, k3, k4 = jax.random.split(key, 4)
    bound1 = 1.0 / math.sqrt(in_features)
    bound2 = 1.0 / math.sqrt(hidden_features)
    w1 = jax.random.uniform(k1, (in_features, hidden_features), dtype, -bound1, bound1)
    b1 = jax.random.uniform(k2, (hidden_features,), dtype, -bound1, bound1)
    w2 = jax.random.uniform(k3, (hidden_features, out_features), dtype, -bound2, bound2)
    b2 = jax.random.uniform(k4, (out_features,), dtype, -bound2, bound2)
    return w1, b1, w2, b2


def _ref_mlp(x, w1, b1, w2, b2):
    """Plain-JAX f32 reference (exact-erf GELU, same as torch.nn.GELU default)."""
    C = x.shape[-1]
    h = x.reshape(-1, C).astype(jnp.float32) @ w1.astype(jnp.float32) + b1.astype(jnp.float32)
    h = 0.5 * h * (1.0 + jax.lax.erf(h * _INV_SQRT2))
    o = h @ w2.astype(jnp.float32) + b2.astype(jnp.float32)
    return o.reshape(x.shape[:-1] + (w2.shape[1],))


if __name__ == "__main__":
    key = jax.random.PRNGKey(0)
    k0, k1, k2, k3 = jax.random.split(key, 4)

    # --- Test 1: toy ViT-token MLP, exact f32 path, resident weights ---------
    B, N, C, HID = 2, 8, 32, 64
    x = jax.random.normal(k0, (B, N, C), dtype=jnp.float32)
    w1, b1, w2, b2 = init_mlp_params(k1, C, HID, C)
    ref = _ref_mlp(x, w1, b1, w2, b2)
    out = jax.block_until_ready(mlp_pallas(x, w1, b1, w2, b2, matmul_dtype=None))
    assert out.shape == (B, N, C)
    assert jnp.allclose(out, ref, atol=1e-5, rtol=1e-5), "f32 resident path mismatch"

    # --- Test 2: bf16-MXU path, pre-cast weights, multi-M-tile grid ----------
    B2, N2, C2, HID2 = 4, 128, 128, 256
    x2 = jax.random.normal(k2, (B2, N2, C2), dtype=jnp.float32)
    w1b, b1b, w2b, b2b = init_mlp_params(k3, C2, HID2, C2)
    ref2 = _ref_mlp(x2, w1b, b1b, w2b, b2b)
    w1_bf, w2_bf = w1b.astype(jnp.bfloat16), w2b.astype(jnp.bfloat16)  # one-time cast
    out2 = jax.block_until_ready(mlp_pallas(x2, w1_bf, b1b, w2_bf, b2b))
    assert out2.shape == (B2, N2, C2)
    assert jnp.allclose(out2, ref2, atol=5e-2, rtol=5e-2), "bf16 path mismatch"

    # --- Test 3: forced hidden-dim tiling (accumulation path), exact f32 -----
    out3 = jax.block_until_ready(
        mlp_pallas(x2, w1b, b1b, w2b, b2b, matmul_dtype=None, force_th=128))
    assert out3.shape == (B2, N2, C2)
    assert jnp.allclose(out3, ref2, atol=1e-4, rtol=1e-4), "tiled-H path mismatch"

    print("KERNEL_OK")
</pallas_src>

<mosaic_0001>
module attributes {stable_mosaic.version = 11 : i64} {
  func.func @_mlp_kernel_resident(%arg0: i32, %arg1: memref<128x32xf32, #tpu.memory_space<vmem>>, %arg2: memref<32x128xf32, #tpu.memory_space<vmem>>, %arg3: memref<1x128xf32, #tpu.memory_space<vmem>>, %arg4: memref<128x128xf32, #tpu.memory_space<vmem>>, %arg5: memref<1x128xf32, #tpu.memory_space<vmem>>, %arg6: memref<128x128xf32, #tpu.memory_space<vmem>>) attributes {dimension_semantics = [#tpu.dimension_semantics<parallel>], iteration_bounds = array<i64: 1>, scalar_prefetch = 0 : i64, scratch_operands = 0 : i64, tpu.core_type = #tpu.core_type<tc>, window_params = [{transform_indices = @transform_0, window_bounds = array<i64: 128, 32>}, {pipeline_mode = #tpu.pipeline_mode<synchronous>, transform_indices = @transform_1, window_bounds = array<i64: 32, 128>}, {pipeline_mode = #tpu.pipeline_mode<synchronous>, transform_indices = @transform_2, window_bounds = array<i64: 1, 128>}, {pipeline_mode = #tpu.pipeline_mode<synchronous>, transform_indices = @transform_3, window_bounds = array<i64: 128, 128>}, {pipeline_mode = #tpu.pipeline_mode<synchronous>, transform_indices = @transform_4, window_bounds = array<i64: 1, 128>}, {transform_indices = @transform_5, window_bounds = array<i64: 128, 128>}]} {
    %c0 = arith.constant 0 : index
    %c0_0 = arith.constant 0 : index
    %0 = vector.load %arg1[%c0, %c0_0] : memref<128x32xf32, #tpu.memory_space<vmem>>, vector<128x32xf32>
    %c0_1 = arith.constant 0 : index
    %c0_2 = arith.constant 0 : index
    %1 = vector.load %arg2[%c0_1, %c0_2] : memref<32x128xf32, #tpu.memory_space<vmem>>, vector<32x128xf32>
    %cst = arith.constant dense<0.000000e+00> : vector<128x128xf32>
    %2 = tpu.matmul %0, %1, %cst {dimension_numbers = #tpu.dot_dimension_numbers<[1], [0], [0], [1], [0, 0, 1, 1], [], []>} : vector<128x32xf32>, vector<32x128xf32>, vector<128x128xf32> -> vector<128x128xf32>
    %c0_3 = arith.constant 0 : index
    %c0_4 = arith.constant 0 : index
    %3 = vector.load %arg3[%c0_3, %c0_4] : memref<1x128xf32, #tpu.memory_space<vmem>>, vector<1x128xf32>
    %4 = vector.broadcast %3 : vector<1x128xf32> to vector<128x128xf32>
    %5 = arith.addf %2, %4 : vector<128x128xf32>
    %cst_5 = arith.constant 5.000000e-01 : f32
    %6 = vector.broadcast %cst_5 : f32 to vector<128x128xf32>
    %7 = arith.mulf %6, %5 : vector<128x128xf32>
    %cst_6 = arith.constant 0.707106769 : f32
    %8 = vector.broadcast %cst_6 : f32 to vector<128x128xf32>
    %9 = arith.mulf %5, %8 : vector<128x128xf32>
    %10 = math.erf %9 : vector<128x128xf32>
    %cst_7 = arith.constant 1.000000e+00 : f32
    %11 = vector.broadcast %cst_7 : f32 to vector<128x128xf32>
    %12 = arith.addf %11, %10 : vector<128x128xf32>
    %13 = arith.mulf %7, %12 : vector<128x128xf32>
    %c0_8 = arith.constant 0 : index
    %c0_9 = arith.constant 0 : index
    %14 = vector.load %arg4[%c0_8, %c0_9] : memref<128x128xf32, #tpu.memory_space<vmem>>, vector<128x128xf32>
    %cst_10 = arith.constant dense<0.000000e+00> : vector<128x128xf32>
    %15 = tpu.matmul %13, %14, %cst_10 {dimension_numbers = #tpu.dot_dimension_numbers<[1], [0], [0], [1], [0, 0, 1, 1], [], []>} : vector<128x128xf32>, vector<128x128xf32>, vector<128x128xf32> -> vector<128x128xf32>
    %c0_11 = arith.constant 0 : index
    %c0_12 = arith.constant 0 : index
    %16 = vector.load %arg5[%c0_11, %c0_12] : memref<1x128xf32, #tpu.memory_space<vmem>>, vector<1x128xf32>
    %17 = vector.broadcast %16 : vector<1x128xf32> to vector<128x128xf32>
    %18 = arith.addf %15, %17 : vector<128x128xf32>
    %c0_13 = arith.constant 0 : index
    %c0_14 = arith.constant 0 : index
    %19 = vector.load %arg6[%c0_13, %c0_14] : memref<128x128xf32, #tpu.memory_space<vmem>>, vector<128x128xf32>
    tpu.vector_store %arg6[%c0_13, %c0_14], %18 {strides = array<i32>} : memref<128x128xf32, #tpu.memory_space<vmem>>, vector<128x128xf32>,
    return
  }
  func.func @transform_0(%arg0: i32) -> (i32, i32) {
    %c0_i32 = arith.constant 0 : i32
    %c0_i32_0 = arith.constant 0 : i32
    return %arg0, %c0_i32 : i32, i32
  }
  func.func @transform_1(%arg0: i32) -> (i32, i32) {
    %c0_i32 = arith.constant 0 : i32
    %c0_i32_0 = arith.constant 0 : i32
    %c0_i32_1 = arith.constant 0 : i32
    return %c0_i32, %c0_i32_0 : i32, i32
  }
  func.func @transform_2(%arg0: i32) -> (i32, i32) {
    %c0_i32 = arith.constant 0 : i32
    %c0_i32_0 = arith.constant 0 : i32
    %c0_i32_1 = arith.constant 0 : i32
    return %c0_i32, %c0_i32_0 : i32, i32
  }
  func.func @transform_3(%arg0: i32) -> (i32, i32) {
    %c0_i32 = arith.constant 0 : i32
    %c0_i32_0 = arith.constant 0 : i32
    %c0_i32_1 = arith.constant 0 : i32
    return %c0_i32, %c0_i32_0 : i32, i32
  }
  func.func @transform_4(%arg0: i32) -> (i32, i32) {
    %c0_i32 = arith.constant 0 : i32
    %c0_i32_0 = arith.constant 0 : i32
    %c0_i32_1 = arith.constant 0 : i32
    return %c0_i32, %c0_i32_0 : i32, i32
  }
  func.func @transform_5(%arg0: i32) -> (i32, i32) {
    %c0_i32 = arith.constant 0 : i32
    %c0_i32_0 = arith.constant 0 : i32
    return %arg0, %c0_i32 : i32, i32
  }
}

</mosaic_0001>

<bundles_post_ra>
// kernel: tpu_custom_call.1
= control target key start
LH: loop header
LB: loop body
LE: loop exit
PB: predicated region body
PF: predicated region fallthrough
CT: control target
= control target key end

     0   :  { %vm48_vm0 = vcmask 261120   ;;  %s1000_s0 = inlined_call_operand.vmem [shape: f32[128,32], index: 0, kind: input, shape index: {}]   ;;  %s1001_s1 = inlined_call_operand.vmem [shape: f32[32,128], index: 1, kind: input, shape index: {}]   ;;  %s1002_s2 = inlined_call_operand.vmem [shape: f32[1,128], index: 2, kind: input, shape index: {}]   ;;  %s1003_s3 = inlined_call_operand.vmem [shape: f32[128,128], index: 3, kind: input, shape index: {}]   ;;  %s1004_s4 = inlined_call_operand.vmem [shape: f32[1,128], index: 4, kind: input, shape index: {}]   ;;  %s1005_s5 = inlined_call_operand.hbm [shape: f32[128,128], index: 5, kind: output, shape index: {}]  }
   0x1   :  { %v37_v0 = vld [vmem:[%s1001_s1] sm:$0xff]  ;;  %v38_v1 = vld [vmem:[%s1001_s1 + $0x8] sm:$0xff]  ;;  %v39_v2 = vld [vmem:[%s1001_s1 + $0x10] sm:$0xff] }
   0x2   :  { %v680_v3 = vpack.c.bf16 %v38_v1, %v37_v0  ;;  %v40_v4 = vld [vmem:[%s1001_s1 + $0x18] sm:$0xff]  ;;  %v21_v5 = vld [vmem:[%s1000_s0] sm:$0xff]  ;;  %v323_v8 = vld [vmem:[%s1003_s3 + $0x8] sm:$0xff] }
   0x3   :  { %v684_v6 = vpack.c.bf16 %v40_v4, %v39_v2  ;;  %600 = vmatprep.mubr.msk.f32.mxu0 %vm48_vm0, %v21_v5  ;;  %v322_v7 = vld [vmem:[%s1003_s3] sm:$0xff]  ;;  %v324_v9 = vld [vmem:[%s1003_s3 + $0x10] sm:$0xff]  ;;  %v325_v10 = vld [vmem:[%s1003_s3 + $0x18] sm:$0xff] }
   0x4   :  { %681 = vmatprep.subr.bf16.mxu0 %v680_v3  ;;  %v22_v11 = vld [vmem:[%s1000_s0 + $0x8] sm:$0xff]  ;;  %v688_v12 = vpack.c.bf16 %v323_v8, %v322_v7 }
   0x5   :  { %683 = vmatpush3.bf16.msra.mxu0 %v680_v3 }
   0x6   :  { %685 = vmatprep.subr.bf16.mxu0 %v684_v6 }
   0x9   :  { %687 = vmatpush3.bf16.msra.mxu0 %v684_v6 }
   0xa   :  { %10 = vsyncpa [#allocation3], 0  ;;  %v23_v13 = vld [vmem:[%s1000_s0 + $0x10] sm:$0xff]  ;;  %v692_v14 = vpack.c.bf16 %v325_v10, %v324_v9  ;;  %689 = vmatprep.subr.bf16.mxu0 %v688_v12  ;;  %v326_v15 = vld [vmem:[%s1003_s3 + $0x20] sm:$0xff]  ;;  %720 = vmatprep.subr.bf16.mxu1 %v688_v12 }
   0xb   :  { %v327_v16 = vld [vmem:[%s1003_s3 + $0x28] sm:$0xff]  ;;  %728 = vmatpush3.bf16.msra.mxu1 %v688_v12  ;;  %v24_v17 = vld [vmem:[%s1000_s0 + $0x18] sm:$0xff]  ;;  %v25_v18 = vld [vmem:[%s1000_s0 + $0x20] sm:$0xff] }
   0xc   :  { %601 = vmatmul.mubr.msk.f32.vlgmr.msra.gmra.mrb[0].mxu0 %vm48_vm0, %v22_v11  ;;  %v696_v19 = vpack.c.bf16 %v327_v16, %v326_v15  ;;  %721 = vmatprep.subr.bf16.mxu1 %v692_v14  ;;  %v26_v20 = vld [vmem:[%s1000_s0 + $0x28] sm:$0xff]  ;;  %v27_v21 = vld [vmem:[%s1000_s0 + $0x30] sm:$0xff]  ;;  %v28_v22 = vld [vmem:[%s1000_s0 + $0x38] sm:$0xff] }
   0xd   :  { %603 = vmatprep.mubr.msk.f32.mxu0 %vm48_vm0, %v23_v13  ;;  %691 = vmatpush3.bf16.msra.mxu0 %v688_v12  ;;  %v29_v23 = vld [vmem:[%s1000_s0 + $0x40] sm:$0xff]  ;;  %v30_v24 = vld [vmem:[%s1000_s0 + $0x48] sm:$0xff]  ;;  %v31_v25 = vld [vmem:[%s1000_s0 + $0x50] sm:$0xff] }
   0xe   :  { %693 = vmatprep.subr.bf16.mxu0 %v692_v14  ;;  %v32_v26 = vld [vmem:[%s1000_s0 + $0x58] sm:$0xff]  ;;  %v33_v27 = vld [vmem:[%s1000_s0 + $0x60] sm:$0xff]  ;;  %v34_v28 = vld [vmem:[%s1000_s0 + $0x68] sm:$0xff] }
   0xf   :  { %729 = vmatpush3.bf16.msra.mxu1 %v692_v14  ;;  %v35_v29 = vld [vmem:[%s1000_s0 + $0x70] sm:$0xff]  ;;  %v36_v30 = vld [vmem:[%s1000_s0 + $0x78] sm:$0xff]  ;;  %v330_v34 = vld [vmem:[%s1003_s3 + $0x40] sm:$0xff] }
  0x10   :  { %604 = vmatmul.mubr.msk.f32.gmra.mrb[2].mxu0 %vm48_vm0, %v24_v17  ;;  %722 = vmatprep.subr.bf16.mxu1 %v696_v19  ;;  %v328_v31 = vld [vmem:[%s1003_s3 + $0x30] sm:$0xff]  ;;  %v329_v32 = vld [vmem:[%s1003_s3 + $0x38] sm:$0xff]  ;;  %v331_v35 = vld [vmem:[%s1003_s3 + $0x48] sm:$0xff] }
  0x11   :  { %606 = vmatprep.mubr.msk.f32.mxu0 %vm48_vm0, %v25_v18  ;;  %695 = vmatpush3.bf16.msra.mxu0 %v692_v14  ;;  %v700_v33 = vpack.c.bf16 %v329_v32, %v328_v31  ;;  %v704_v36 = vpack.c.bf16 %v331_v35, %v330_v34  ;;  %v332_v37 = vld [vmem:[%s1003_s3 + $0x50] sm:$0xff]  ;;  %v333_v38 = vld [vmem:[%s1003_s3 + $0x58] sm:$0xff]  ;;  %v334_v40 = vld [vmem:[%s1003_s3 + $0x60] sm:$0xff] }
  0x12   :  { %697 = vmatprep.subr.bf16.mxu0 %v696_v19  ;;  %v708_v39 = vpack.c.bf16 %v333_v38, %v332_v37  ;;  %v335_v41 = vld [vmem:[%s1003_s3 + $0x68] sm:$0xff]  ;;  %v336_v43 = vld [vmem:[%s1003_s3 + $0x70] sm:$0xff]  ;;  %v337_v44 = vld [vmem:[%s1003_s3 + $0x78] sm:$0xff] }
  0x13   :  { %730 = vmatpush3.bf16.msra.mxu1 %v696_v19  ;;  %v712_v42 = vpack.c.bf16 %v335_v41, %v334_v40  ;;  %v716_v45 = vpack.c.bf16 %v337_v44, %v336_v43  ;;  %v955_v46 = vld [vmem:[%s1002_s2] ss:$0 sm:$0xff] }
  0x14   :  { %607 = vmatmul.mubr.msk.f32.gmra.mrb[4].mxu0 %vm48_vm0, %v26_v20  ;;  %723 = vmatprep.subr.bf16.mxu1 %v700_v33 }
  0x15   :  { %609 = vmatprep.mubr.msk.f32.mxu0 %vm48_vm0, %v27_v21  ;;  %699 = vmatpush3.bf16.msra.mxu0 %v696_v19 }
  0x16   :  { %701 = vmatprep.subr.bf16.mxu0 %v700_v33 }
  0x17   :  { %731 = vmatpush3.bf16.msra.mxu1 %v700_v33 }
  0x18   :  { %610 = vmatmul.mubr.msk.f32.gmra.mrb[6].mxu0 %vm48_vm0, %v28_v22  ;;  %724 = vmatprep.subr.bf16.mxu1 %v704_v36 }
  0x19   :  { %612 = vmatprep.mubr.msk.f32.mxu0 %vm48_vm0, %v29_v23  ;;  %703 = vmatpush3.bf16.msra.mxu0 %v700_v33 }
  0x1a   :  { %705 = vmatprep.subr.bf16.mxu0 %v704_v36 }
  0x1b   :  { %732 = vmatpush3.bf16.msra.mxu1 %v704_v36 }
  0x1c   :  { %613 = vmatmul.mubr.msk.f32.gmra.mrb[8].mxu0 %vm48_vm0, %v30_v24  ;;  %725 = vmatprep.subr.bf16.mxu1 %v708_v39 }
  0x1d   :  { %615 = vmatprep.mubr.msk.f32.mxu0 %vm48_vm0, %v31_v25  ;;  %707 = vmatpush3.bf16.msra.mxu0 %v704_v36 }
  0x1e   :  { %709 = vmatprep.subr.bf16.mxu0 %v708_v39 }
  0x1f   :  { %733 = vmatpush3.bf16.msra.mxu1 %v708_v39 }
  0x20   :  { %616 = vmatmul.mubr.msk.f32.gmra.mrb[10].mxu0 %vm48_vm0, %v32_v26  ;;  %726 = vmatprep.subr.bf16.mxu1 %v712_v42 }
  0x21   :  { %618 = vmatprep.mubr.msk.f32.mxu0 %vm48_vm0, %v33_v27  ;;  %711 = vmatpush3.bf16.msra.mxu0 %v708_v39 }
  0x22   :  { %713 = vmatprep.subr.bf16.mxu0 %v712_v42 }
  0x23   :  { %734 = vmatpush3.bf16.msra.mxu1 %v712_v42 }
  0x24   :  { %619 = vmatmul.mubr.msk.f32.gmra.mrb[12].mxu0 %vm48_vm0, %v34_v28  ;;  %727 = vmatprep.subr.bf16.mxu1 %v716_v45 }
  0x25   :  { %621 = vmatprep.mubr.msk.f32.mxu0 %vm48_vm0, %v35_v29  ;;  %715 = vmatpush3.bf16.msra.mxu0 %v712_v42 }
  0x26   :  { %717 = vmatprep.subr.bf16.mxu0 %v716_v45 }
  0x27   :  { %735 = vmatpush3.bf16.msra.mxu1 %v716_v45 }
  0x28   :  { %622 = vmatmul.mubr.msk.f32.gmra.mrb[14].mxu0 %vm48_vm0, %v36_v30 }
  0x29   :  { %719 = vmatpush3.bf16.msra.mxu0 %v716_v45 }
  0xdf   :  { %v602_v47 = vpop.f32.mrb[0].mxu0 }
  0xe0   :  { %v169_v48 = vadd.f32 %v602_v47, %v955_v46  ;;  %v163_v49 = vpop.f32.mrb[1].mxu0 }
  0xe1   :  { %v164_v50 = vadd.f32 %v955_v46, %v163_v49 }
  0xe2   :  { %v259_v51 = vmul.f32 0.70710677, %v169_v48  ;;  %v243_v15 = vmul.f32 0.5, %v169_v48 }
  0xe3   :  { %v258_v52 = vmul.f32 0.70710677, %v164_v50  ;;  %v605_v53 = vpop.f32.mrb[2].mxu0  ;;  %v242_v11 = vmul.f32 0.5, %v164_v50 }
  0xe4   :  { %739 = verf.f32 %v259_v51  ;;  %v179_v54 = vadd.f32 %v605_v53, %v955_v46  ;;  %v173_v55 = vpop.f32.mrb[3].mxu0 }
  0xe5   :  { %741 = verf.f32 %v258_v52  ;;  %v174_v56 = vadd.f32 %v955_v46, %v173_v55 }
  0xe6   :  { %v261_v57 = vmul.f32 0.70710677, %v179_v54  ;;  %v245_v29 = vmul.f32 0.5, %v179_v54 }
  0xe7   :  { %v260_v58 = vmul.f32 0.70710677, %v174_v56  ;;  %v608_v59 = vpop.f32.mrb[4].mxu0  ;;  %v244_v25 = vmul.f32 0.5, %v174_v56 }
  0xe8   :  { %743 = verf.f32 %v261_v57  ;;  %v189_v60 = vadd.f32 %v608_v59, %v955_v46  ;;  %v183_v61 = vpop.f32.mrb[5].mxu0 }
  0xe9   :  { %745 = verf.f32 %v260_v58  ;;  %v184_v62 = vadd.f32 %v955_v46, %v183_v61 }
  0xea   :  { %v263_v63 = vmul.f32 0.70710677, %v189_v60  ;;  %v247_v43 = vmul.f32 0.5, %v189_v60 }
  0xeb   :  { %v262_v0 = vmul.f32 0.70710677, %v184_v62  ;;  %v611_v1 = vpop.f32.mrb[6].mxu0  ;;  %v246_v39 = vmul.f32 0.5, %v184_v62 }
  0xec   :  { %747 = verf.f32 %v263_v63  ;;  %v964_v2 = vadd.f32 %v611_v1, %v955_v46  ;;  %v193_v3 = vpop.f32.mrb[7].mxu0 }
  0xed   :  { %749 = verf.f32 %v262_v0  ;;  %v194_v4 = vadd.f32 %v955_v46, %v193_v3 }
  0xee   :  { %v740_v5 = vpop.eup %739  ;;  %v265_v6 = vmul.f32 0.70710677, %v964_v2  ;;  %v249_v58 = vmul.f32 0.5, %v964_v2 }
  0xef   :  { %v742_v7 = vpop.eup %741  ;;  %v291_v8 = vadd.f32 1.0, %v740_v5  ;;  %v264_v9 = vmul.f32 0.70710677, %v194_v4  ;;  %v614_v10 = vpop.f32.mrb[8].mxu0  ;;  %v248_v56 = vmul.f32 0.5, %v194_v4 }
  0xf0   :  { %v290_v12 = vadd.f32 1.0, %v742_v7  ;;  %751 = verf.f32 %v265_v6  ;;  %v969_v13 = vadd.f32 %v614_v10, %v955_v46  ;;  %v203_v14 = vpop.f32.mrb[9].mxu0 }
  0xf1   :  { %753 = verf.f32 %v264_v9  ;;  %v204_v16 = vadd.f32 %v955_v46, %v203_v14  ;;  %v307_v21 = vmul.f32 %v291_v8, %v243_v15 }
  0xf2   :  { %v744_v17 = vpop.eup %743  ;;  %v267_v18 = vmul.f32 0.70710677, %v969_v13  ;;  %v306_v19 = vmul.f32 %v290_v12, %v242_v11  ;;  %v251_v4 = vmul.f32 0.5, %v969_v13 }
  0xf3   :  { %v746_v20 = vpop.eup %745  ;;  %v293_v22 = vadd.f32 1.0, %v744_v17  ;;  %v266_v23 = vmul.f32 0.70710677, %v204_v16  ;;  %v617_v24 = vpop.f32.mrb[10].mxu0  ;;  %v250_v5 = vmul.f32 0.5, %v204_v16 }
  0xf4   :  { %v292_v26 = vadd.f32 1.0, %v746_v20  ;;  %755 = verf.f32 %v267_v18  ;;  %v974_v27 = vadd.f32 %v617_v24, %v955_v46  ;;  %v213_v28 = vpop.f32.mrb[11].mxu0  ;;  %656 = vmatprep.mubr.f32.mxu0 %v306_v19 }
  0xf5   :  { %757 = verf.f32 %v266_v23  ;;  %v214_v30 = vadd.f32 %v955_v46, %v213_v28  ;;  %657 = vmatmul.mubr.f32.vlgmr.msra.gmra.mrb[16].mxu0 %v307_v21  ;;  %v309_v38 = vmul.f32 %v293_v22, %v245_v29 }
  0xf6   :  { %v748_v31 = vpop.eup %747  ;;  %v269_v32 = vmul.f32 0.70710677, %v974_v27  ;;  %v308_v33 = vmul.f32 %v292_v26, %v244_v25  ;;  %v253_v12 = vmul.f32 0.5, %v974_v27 }
  0xf7   :  { %v750_v34 = vpop.eup %749  ;;  %v295_v35 = vadd.f32 1.0, %v748_v31  ;;  %v268_v36 = vmul.f32 0.70710677, %v214_v30  ;;  %v620_v37 = vpop.f32.mrb[12].mxu0  ;;  %v252_v10 = vmul.f32 0.5, %v214_v30 }
  0xf8   :  { %v294_v40 = vadd.f32 1.0, %v750_v34  ;;  %759 = verf.f32 %v269_v32  ;;  %v229_v41 = vadd.f32 %v620_v37, %v955_v46  ;;  %v223_v42 = vpop.f32.mrb[13].mxu0  ;;  %659 = vmatprep.mubr.f32.mxu0 %v308_v33  ;;  %v539_v31 = vld [vmem:[%s1004_s4] ss:$0 sm:$0xff]  ;;  %s795_s4 = smov [#allocation2]  }
  0xf9   :  { %761 = verf.f32 %v268_v36  ;;  %v224_v44 = vadd.f32 %v955_v46, %v223_v42  ;;  %660 = vmatmul.mubr.f32.gmra.mrb[18].mxu0 %v309_v38  ;;  %v311_v53 = vmul.f32 %v295_v35, %v247_v43  ;;  %s511_s13 = sshll.u32 %s795_s4, 4  ;;  %s512_s13 = int_to_ptr.vmem [resolvable:$true] %s511_s13 }
  0xfa   :  { %v752_v45 = vpop.eup %751  ;;  %v271_v47 = vmul.f32 0.70710677, %v229_v41  ;;  %v310_v48 = vmul.f32 %v294_v40, %v246_v39  ;;  %v255_v20 = vmul.f32 0.5, %v229_v41  ;;  %s771_s14 = scalar_lea.vmem %s512_s13, 2048  ;;  %p776_p1 = scmp.lt.s32.totalorder %s512_s13, %s512_s13 }
  0xfb   :  { %v754_v49 = vpop.eup %753  ;;  %v297_v50 = vadd.f32 1.0, %v752_v45  ;;  %v270_v51 = vmul.f32 0.70710677, %v224_v44  ;;  %v623_v52 = vpop.f32.mrb[14].mxu0  ;;  %v254_v19 = vmul.f32 0.5, %v224_v44  ;;  %p772_p0 = scmp.ne.s32.totalorder %s512_s13, %s771_s14  ;;  %p777_p2 = scmp.lt.s32.totalorder %s771_s14, %s771_s14 }
  0xfc   :  { %763 = verf.f32 %v271_v47  ;;  %v239_v54 = vadd.f32 %v623_v52, %v955_v46  ;;  %v233_v55 = vpop.f32.mrb[15].mxu0  ;;  %662 = vmatprep.mubr.f32.mxu0 %v310_v48  ;;  %v296_v57 = vadd.f32 1.0, %v754_v49 }
  0xfd   :  { %765 = verf.f32 %v270_v51  ;;  %v234_v59 = vadd.f32 %v955_v46, %v233_v55  ;;  %663 = vmatmul.mubr.f32.gmra.mrb[20].mxu0 %v311_v53  ;;  %v313_v3 = vmul.f32 %v297_v50, %v249_v58  ;;  %p778_p3 = por %p777_p2, %p776_p1 }
  0xfe   :  { %v756_v60 = vpop.eup %755  ;;  %v273_v61 = vmul.f32 0.70710677, %v239_v54  ;;  %v312_v62 = vmul.f32 %v296_v57, %v248_v56  ;;  %v257_v27 = vmul.f32 0.5, %v239_v54 }
  0xff   :  { %v758_v63 = vpop.eup %757  ;;  %v299_v0 = vadd.f32 1.0, %v756_v60  ;;  %v272_v1 = vmul.f32 0.70710677, %v234_v59  ;;  %v256_v26 = vmul.f32 0.5, %v234_v59  ;;  %p779_p4 = pnand %p778_p3, %p772_p0 }
 0x100   :  { %v298_v6 = vadd.f32 1.0, %v758_v63  ;;  %767 = verf.f32 %v273_v61  ;;  %665 = vmatprep.mubr.f32.mxu1 %v312_v62 }
 0x101   :  { %769 = verf.f32 %v272_v1  ;;  %666 = vmatmul.mubr.f32.vlgmr.msra.gmra.mrb[0].mxu1 %v313_v3  ;;  %v315_v9 = vmul.f32 %v299_v0, %v251_v4 }
 0x102   :  { %v760_v2 = vpop.eup %759  ;;  %v314_v7 = vmul.f32 %v298_v6, %v250_v5 }
 0x103   :  { %v762_v8 = vpop.eup %761  ;;  %v301_v46 = vadd.f32 1.0, %v760_v2 }
 0x104   :  { %v300_v11 = vadd.f32 1.0, %v762_v8  ;;  %668 = vmatprep.mubr.f32.mxu1 %v314_v7 }
 0x105   :  { %669 = vmatmul.mubr.f32.gmra.mrb[2].mxu1 %v315_v9  ;;  %v317_v18 = vmul.f32 %v301_v46, %v253_v12 }
 0x106   :  { %v764_v14 = vpop.eup %763  ;;  %v316_v15 = vmul.f32 %v300_v11, %v252_v10 }
 0x107   :  { %v766_v16 = vpop.eup %765  ;;  %v303_v17 = vadd.f32 1.0, %v764_v14 }
 0x108   :  { %v302_v13 = vadd.f32 1.0, %v766_v16  ;;  %671 = vmatprep.mubr.f32.mxu1 %v316_v15 }
 0x109   :  { %672 = vmatmul.mubr.f32.gmra.mrb[4].mxu1 %v317_v18  ;;  %v319_v25 = vmul.f32 %v303_v17, %v255_v20 }
 0x10a   :  { %v768_v21 = vpop.eup %767  ;;  %v318_v22 = vmul.f32 %v302_v13, %v254_v19 }
 0x10b   :  { %v770_v23 = vpop.eup %769  ;;  %v305_v24 = vadd.f32 1.0, %v768_v21 }
 0x10c   :  { %v304_v28 = vadd.f32 1.0, %v770_v23  ;;  %674 = vmatprep.mubr.f32.mxu1 %v318_v22 }
 0x10d   :  { %675 = vmatmul.mubr.f32.gmra.mrb[6].mxu1 %v319_v25  ;;  %v321_v30 = vmul.f32 %v305_v24, %v257_v27 }
 0x10e   :  { %v320_v29 = vmul.f32 %v304_v28, %v256_v26 }
 0x110   :  { %677 = vmatprep.mubr.f32.mxu1 %v320_v29 }
 0x111   :  { %678 = vmatmul.mubr.f32.gmra.mrb[8].mxu1 %v321_v30 }
 0x1c8   :  { %v658_v32 = vpop.f32.mrb[16].mxu0 }
 0x1c9   :  { %v417_v33 = vadd.f32 %v658_v32, %v539_v31  ;;  %v411_v34 = vpop.f32.mrb[17].mxu0 }
 0x1ca   :  { %v412_v35 = vadd.f32 %v539_v31, %v411_v34 }
 0x1cb   :  { %491 = vst [vmem:[#allocation2 + $0x8] sm:$0xff] %v417_v33 }
 0x1cc   :  { %490 = vst [vmem:[#allocation2] sm:$0xff] %v412_v35  ;;  %v661_v36 = vpop.f32.mrb[18].mxu0 }
 0x1cd   :  { %v427_v37 = vadd.f32 %v661_v36, %v539_v31  ;;  %v421_v38 = vpop.f32.mrb[19].mxu0 }
 0x1ce   :  { %v422_v39 = vadd.f32 %v539_v31, %v421_v38 }
 0x1cf   :  { %493 = vst [vmem:[#allocation2 + $0x18] sm:$0xff] %v427_v37 }
 0x1d0   :  { %492 = vst [vmem:[#allocation2 + $0x10] sm:$0xff] %v422_v39  ;;  %v664_v40 = vpop.f32.mrb[20].mxu0 }
 0x1d1   :  { %v437_v41 = vadd.f32 %v664_v40, %v539_v31  ;;  %v431_v42 = vpop.f32.mrb[21].mxu0 }
 0x1d2   :  { %v432_v43 = vadd.f32 %v539_v31, %v431_v42 }
 0x1d3   :  { %495 = vst [vmem:[#allocation2 + $0x28] sm:$0xff] %v437_v41 }
 0x1d4   :  { %494 = vst [vmem:[#allocation2 + $0x20] sm:$0xff] %v432_v43  ;;  %v667_v44 = vpop.f32.mrb[0].mxu1 }
 0x1d5   :  { %v447_v45 = vadd.f32 %v667_v44, %v539_v31  ;;  %v441_v47 = vpop.f32.mrb[1].mxu1 }
 0x1d6   :  { %v442_v48 = vadd.f32 %v539_v31, %v441_v47 }
 0x1d7   :  { %497 = vst [vmem:[#allocation2 + $0x38] sm:$0xff] %v447_v45 }
 0x1d8   :  { %496 = vst [vmem:[#allocation2 + $0x30] sm:$0xff] %v442_v48  ;;  %v670_v49 = vpop.f32.mrb[2].mxu1 }
 0x1d9   :  { %v457_v50 = vadd.f32 %v670_v49, %v539_v31  ;;  %v451_v51 = vpop.f32.mrb[3].mxu1 }
 0x1da   :  { %v452_v52 = vadd.f32 %v539_v31, %v451_v51 }
 0x1db   :  { %499 = vst [vmem:[#allocation2 + $0x48] sm:$0xff] %v457_v50 }
 0x1dc   :  { %498 = vst [vmem:[#allocation2 + $0x40] sm:$0xff] %v452_v52  ;;  %v673_v53 = vpop.f32.mrb[4].mxu1 }
 0x1dd   :  { %v467_v54 = vadd.f32 %v673_v53, %v539_v31  ;;  %v461_v55 = vpop.f32.mrb[5].mxu1 }
 0x1de   :  { %v462_v56 = vadd.f32 %v539_v31, %v461_v55 }
 0x1df   :  { %501 = vst [vmem:[#allocation2 + $0x58] sm:$0xff] %v467_v54 }
 0x1e0   :  { %500 = vst [vmem:[#allocation2 + $0x50] sm:$0xff] %v462_v56  ;;  %v676_v57 = vpop.f32.mrb[6].mxu1 }
 0x1e1   :  { %v477_v58 = vadd.f32 %v676_v57, %v539_v31  ;;  %v471_v59 = vpop.f32.mrb[7].mxu1 }
 0x1e2   :  { %v472_v60 = vadd.f32 %v539_v31, %v471_v59 }
 0x1e3   :  { %503 = vst [vmem:[#allocation2 + $0x68] sm:$0xff] %v477_v58 }
 0x1e4   :  { %502 = vst [vmem:[#allocation2 + $0x60] sm:$0xff] %v472_v60  ;;  %v679_v61 = vpop.f32.mrb[8].mxu1 }
 0x1e5   :  { %v487_v62 = vadd.f32 %v679_v61, %v539_v31  ;;  %v481_v63 = vpop.f32.mrb[9].mxu1 }
 0x1e6   :  { %v482_v0 = vadd.f32 %v539_v31, %v481_v63 }
 0x1e7   :  { %505 = vst [vmem:[#allocation2 + $0x78] sm:$0xff] %v487_v62 }
 0x1e8   :  { %504 = vst [vmem:[#allocation2 + $0x70] sm:$0xff] %v482_v0 }
 0x1e9   :  { %782 = shalt.err (!%p779_p4)
}
 0x1ea   :  { %s783_s17 = scalar_lea.hbm %s1005_s5, 2048 }
 0x1eb   :  { %p784_p5 = scmp.ne.s32.totalorder %s1005_s5, %s783_s17  ;;  %p787_p6 = scmp.lt.u32.totalorder %s783_s17, %s1005_s5 }
 0x1ed   :  { %p789_p7 = pnand %p787_p6, %p784_p5 }
 0x1ef   :  { %792 = shalt.err (!%p789_p7)
}
 0x1f0   :  { %s796_s22 = smov 128   ;;  %s797_s23 = smov 8  }
 0x1f1   :  { %517 = dma.vmem_to_hbm [thread:$0]  %s512_s13, 2048, %s1005_s5, [#allocation3], %s796_s22, %s796_s22, %s797_s23  }
 0x1f2   :  { %793 = dma.done.wait [#allocation3], 2048  }
 0x1f3   :  { %794 = vsyncadd [#allocation3], 4294965248 }
 0x1f4   :  { %521 = vsyncpa [#allocation3], 1 }

</bundles_post_ra>
